<compile_context>
chip_gen: v6e
topology: v6e:2x2x1
jax: 0.10.0
libtpu: 0.0.40
codegen_flags: <defaults>
</compile_context>

<pallas_src>
import jax
import jax.numpy as jnp
from jax.experimental import pallas as pl
from jax.experimental.pallas import tpu as pltpu

LANE = 128
_MIB = 1024 * 1024


def _round_up(x, m):
    return (x + m - 1) // m * m


def _mlp_kernel(x_ref,
                w1_ref, b1_ref,
                w2_ref, b2_ref,
                w3_ref, b3_ref,
                w4_ref, b4_ref,
                mid_ref, logits_ref):
    """Four bf16 MXU matmuls (f32 accumulation) + bias-add / ReLU fused in VMEM."""
    x = x_ref[...].astype(jnp.bfloat16)          # f32 load, in-kernel cast (VPU)

    h1 = jnp.dot(x, w1_ref[...], preferred_element_type=jnp.float32) + b1_ref[...]
    h1 = jnp.maximum(h1, 0.0).astype(jnp.bfloat16)

    h2 = jnp.dot(h1, w2_ref[...], preferred_element_type=jnp.float32) + b2_ref[...]
    h2 = jnp.maximum(h2, 0.0).astype(jnp.bfloat16)

    mid = jnp.dot(h2, w3_ref[...], preferred_element_type=jnp.float32) + b3_ref[...]
    mid = jnp.maximum(mid, 0.0)                  # f32 (TM, Ep)

    logits = jnp.dot(mid.astype(jnp.bfloat16), w4_ref[...],
                     preferred_element_type=jnp.float32) + b4_ref[...]

    # Lane-dense (multiple-of-128 or full-dim) unmasked stores.
    mid_ref[...] = mid.astype(mid_ref.dtype)
    logits_ref[...] = logits.astype(logits_ref.dtype)


def pack_params(params):
    """One-time bf16 cast + 128-lane zero-padding of all weights/biases.

    Weight layout is (in_features, out_features) (transposed vs PyTorch), biases f32 (1, out).
    Call once at init; the forward consumes only the packed pytree (no per-call recast).
    """
    (w1, b1), (w2, b2), (w3, b3), (w4, b4) = params
    D, H1 = w1.shape
    H2 = w2.shape[1]
    E = w3.shape[1]
    C = w4.shape[1]
    Dp, H1p, H2p = _round_up(D, LANE), _round_up(H1, LANE), _round_up(H2, LANE)
    Ep, Cp = _round_up(E, LANE), _round_up(C, LANE)

    def pad_w(w, rows, cols):
        out = jnp.zeros((rows, cols), jnp.bfloat16)
        return out.at[:w.shape[0], :w.shape[1]].set(w.astype(jnp.bfloat16))

    def pad_b(b, cols):
        out = jnp.zeros((1, cols), jnp.float32)
        return out.at[:, :b.shape[-1]].set(b.reshape(1, -1).astype(jnp.float32))

    packed = (pad_w(w1, Dp, H1p), pad_b(b1, H1p),
              pad_w(w2, H1p, H2p), pad_b(b2, H2p),
              pad_w(w3, H2p, Ep), pad_b(b3, Ep),
              pad_w(w4, Ep, Cp), pad_b(b4, Cp))
    dims = dict(D=D, Dp=Dp, H1p=H1p, H2p=H2p, E=E, Ep=Ep, C=C, Cp=Cp)
    return packed, dims


def _call_mlp(xp, packed, TM, dims, vmem_limit, single_buffer_weights):
    B_pad, Dp = xp.shape
    Ep, Cp = dims["Ep"], dims["Cp"]

    if single_buffer_weights:
        # Grid-invariant operands: one buffer (double-buffering them just wastes VMEM).
        wspec = lambda a: pl.BlockSpec(a.shape, lambda i: (0,) * a.ndim,
                                       pipeline_mode=pl.Buffered(buffer_count=1))
    else:
        wspec = lambda a: pl.BlockSpec(a.shape, lambda i: (0,) * a.ndim)

    return pl.pallas_call(
        _mlp_kernel,
        out_shape=(
            jax.ShapeDtypeStruct((B_pad, Ep), jnp.float32),
            jax.ShapeDtypeStruct((B_pad, Cp), jnp.float32),
        ),
        grid=(B_pad // TM,),
        in_specs=[pl.BlockSpec((TM, Dp), lambda i: (i, 0))]
                 + [wspec(a) for a in packed],
        out_specs=(
            pl.BlockSpec((TM, Ep), lambda i: (i, 0)),
            pl.BlockSpec((TM, Cp), lambda i: (i, 0)),
        ),
        compiler_params=pltpu.CompilerParams(
            dimension_semantics=("parallel",),
            vmem_limit_bytes=vmem_limit,        # None -> compiler default
        ),
    )(xp, *packed)


def final_classifier_forward(fused_features, packed_params, dims):
    """fused_features: (B, num_chunks, gpt_n_embd) -> (mid (B, E), logits (B, C))."""
    packed = packed_params
    B = fused_features.shape[0]
    x = fused_features.reshape(B, -1).astype(jnp.float32)   # .contiguous().view(B, -1)
    D, Dp = dims["D"], dims["Dp"]
    assert x.shape[1] == D

    # Column-pad x only if the flattened feature dim isn't lane-aligned (atypical).
    if Dp != D:
        x = jnp.pad(x, ((0, 0), (0, Dp - D)))

    # Batch tiling: tiny batches -> single full-array block (no padded rows);
    # otherwise >= 2 tiles (both v7x TCs), <= 512 rows/tile, 16-row alignment.
    if B <= 16:
        TM = B
        B_pad = B
    else:
        n_tiles = max(2, pl.cdiv(B, 512))
        TM = _round_up(pl.cdiv(B, n_tiles), 16)
        B_pad = _round_up(B, TM)
    if B_pad != B:
        x = jnp.pad(x, ((0, B_pad - B), (0, 0)))

    # Tight VMEM budget: weights (x2 worst case) + pipelined x/output tiles + live
    # intermediates, with headroom. Only override the compiler default when needed
    # (v5e scoped default is 16 MiB, v6e/v7x 32 MiB).
    weight_bytes = sum(int(a.nbytes) for a in packed)
    io_bytes = 2 * TM * (Dp + dims["Ep"] + dims["Cp"]) * 4
    inter_bytes = TM * (dims["H1p"] + dims["H2p"] + dims["Ep"] + dims["Cp"]) * 4
    est = 2 * weight_bytes + io_bytes + inter_bytes
    vmem_limit = None
    if est > 8 * _MIB:
        vmem_limit = min(int(est * 1.3), 128 * _MIB)

    try:
        mid_p, logits_p = _call_mlp(x, packed, TM, dims, vmem_limit,
                                    single_buffer_weights=True)
    except Exception:
        # pipeline_mode=pl.Buffered(1) unsupported in this JAX build: fall back to
        # default (double-buffered) weight specs; semantics are identical.
        mid_p, logits_p = _call_mlp(x, packed, TM, dims, vmem_limit,
                                    single_buffer_weights=False)

    return mid_p[:B, :dims["E"]], logits_p[:B, :dims["C"]]


def init_params(key, gpt_n_embd, num_chunks, num_classes):
    """Deterministic PyTorch-style (Kaiming-uniform-ish) init. Weights stored (in, out), f32."""
    D = gpt_n_embd * num_chunks
    shapes = [
        (D, D // 2),
        (D // 2, D // 4),
        (D // 4, gpt_n_embd),
        (gpt_n_embd, num_classes),
    ]
    params = []
    for (fan_in, fan_out) in shapes:
        key, kw, kb = jax.random.split(key, 3)
        bound = 1.0 / jnp.sqrt(fan_in)
        w = jax.random.uniform(kw, (fan_in, fan_out), jnp.float32, -bound, bound)
        b = jax.random.uniform(kb, (1, fan_out), jnp.float32, -bound, bound)
        params.append((w, b))
    return params


if __name__ == "__main__":
    gpt_n_embd = 32
    num_chunks = 8
    num_classes = 10
    batch = 2

    key = jax.random.PRNGKey(0)
    key, kx = jax.random.split(key)
    fused_features = jax.random.normal(
        kx, (batch, num_chunks, gpt_n_embd), dtype=jnp.float32)

    params = init_params(key, gpt_n_embd, num_chunks, num_classes)
    packed_params, dims = pack_params(params)   # one-time bf16 cast + lane padding

    mid, logits = final_classifier_forward(fused_features, packed_params, dims)
    jax.block_until_ready((mid, logits))

    # Reference in plain JAX following the same bf16-operand / f32-accumulate math path.
    (w1, b1), (w2, b2), (w3, b3), (w4, b4) = params
    xb = fused_features.reshape(batch, -1).astype(jnp.bfloat16)
    h1 = jnp.maximum(
        jnp.dot(xb, w1.astype(jnp.bfloat16), preferred_element_type=jnp.float32) + b1, 0.0)
    h2 = jnp.maximum(
        jnp.dot(h1.astype(jnp.bfloat16), w2.astype(jnp.bfloat16),
                preferred_element_type=jnp.float32) + b2, 0.0)
    ref_mid = jnp.maximum(
        jnp.dot(h2.astype(jnp.bfloat16), w3.astype(jnp.bfloat16),
                preferred_element_type=jnp.float32) + b3, 0.0)
    ref_logits = jnp.dot(ref_mid.astype(jnp.bfloat16), w4.astype(jnp.bfloat16),
                         preferred_element_type=jnp.float32) + b4

    assert mid.shape == (batch, gpt_n_embd)
    assert logits.shape == (batch, num_classes)
    assert jnp.allclose(mid, ref_mid, atol=1e-3, rtol=1e-3)
    assert jnp.allclose(logits, ref_logits, atol=1e-3, rtol=1e-3)

    print("KERNEL_OK")
</pallas_src>

<mosaic_0001>
module attributes {stable_mosaic.version = 11 : i64} {
  func.func @_mlp_kernel(%arg0: i32, %arg1: memref<2x256xf32, #tpu.memory_space<vmem>>, %arg2: memref<256x128xbf16, #tpu.memory_space<vmem>>, %arg3: memref<1x128xf32, #tpu.memory_space<vmem>>, %arg4: memref<128x128xbf16, #tpu.memory_space<vmem>>, %arg5: memref<1x128xf32, #tpu.memory_space<vmem>>, %arg6: memref<128x128xbf16, #tpu.memory_space<vmem>>, %arg7: memref<1x128xf32, #tpu.memory_space<vmem>>, %arg8: memref<128x128xbf16, #tpu.memory_space<vmem>>, %arg9: memref<1x128xf32, #tpu.memory_space<vmem>>, %arg10: memref<2x128xf32, #tpu.memory_space<vmem>>, %arg11: memref<2x128xf32, #tpu.memory_space<vmem>>) attributes {dimension_semantics = [#tpu.dimension_semantics<parallel>], iteration_bounds = array<i64: 1>, scalar_prefetch = 0 : i64, scratch_operands = 0 : i64, tpu.core_type = #tpu.core_type<tc>, window_params = [{transform_indices = @transform_0, window_bounds = array<i64: 2, 256>}, {pipeline_mode = #tpu.pipeline_mode<synchronous>, transform_indices = @transform_1, window_bounds = array<i64: 256, 128>}, {pipeline_mode = #tpu.pipeline_mode<synchronous>, transform_indices = @transform_2, window_bounds = array<i64: 1, 128>}, {pipeline_mode = #tpu.pipeline_mode<synchronous>, transform_indices = @transform_3, window_bounds = array<i64: 128, 128>}, {pipeline_mode = #tpu.pipeline_mode<synchronous>, transform_indices = @transform_4, window_bounds = array<i64: 1, 128>}, {pipeline_mode = #tpu.pipeline_mode<synchronous>, transform_indices = @transform_5, window_bounds = array<i64: 128, 128>}, {pipeline_mode = #tpu.pipeline_mode<synchronous>, transform_indices = @transform_6, window_bounds = array<i64: 1, 128>}, {pipeline_mode = #tpu.pipeline_mode<synchronous>, transform_indices = @transform_7, window_bounds = array<i64: 128, 128>}, {pipeline_mode = #tpu.pipeline_mode<synchronous>, transform_indices = @transform_8, window_bounds = array<i64: 1, 128>}, {transform_indices = @transform_9, window_bounds = array<i64: 2, 128>}, {transform_indices = @transform_10, window_bounds = array<i64: 2, 128>}]} {
    %c0 = arith.constant 0 : index
    %c0_0 = arith.constant 0 : index
    %0 = vector.load %arg1[%c0, %c0_0] : memref<2x256xf32, #tpu.memory_space<vmem>>, vector<2x256xf32>
    %1 = arith.truncf %0 : vector<2x256xf32> to vector<2x256xbf16>
    %c0_1 = arith.constant 0 : index
    %c0_2 = arith.constant 0 : index
    %2 = vector.load %arg2[%c0_1, %c0_2] : memref<256x128xbf16, #tpu.memory_space<vmem>>, vector<256x128xbf16>
    %cst = arith.constant dense<0.000000e+00> : vector<2x128xf32>
    %3 = tpu.matmul %1, %2, %cst {dimension_numbers = #tpu.dot_dimension_numbers<[1], [0], [0], [1], [0, 0, 1, 1], [], []>} : vector<2x256xbf16>, vector<256x128xbf16>, vector<2x128xf32> -> vector<2x128xf32>
    %c0_3 = arith.constant 0 : index
    %c0_4 = arith.constant 0 : index
    %4 = vector.load %arg3[%c0_3, %c0_4] : memref<1x128xf32, #tpu.memory_space<vmem>>, vector<1x128xf32>
    %5 = vector.broadcast %4 : vector<1x128xf32> to vector<2x128xf32>
    %6 = arith.addf %3, %5 : vector<2x128xf32>
    %cst_5 = arith.constant 0.000000e+00 : f32
    %7 = vector.broadcast %cst_5 : f32 to vector<2x128xf32>
    %8 = arith.maximumf %6, %7 : vector<2x128xf32>
    %9 = arith.truncf %8 : vector<2x128xf32> to vector<2x128xbf16>
    %c0_6 = arith.constant 0 : index
    %c0_7 = arith.constant 0 : index
    %10 = vector.load %arg4[%c0_6, %c0_7] : memref<128x128xbf16, #tpu.memory_space<vmem>>, vector<128x128xbf16>
    %cst_8 = arith.constant dense<0.000000e+00> : vector<2x128xf32>
    %11 = tpu.matmul %9, %10, %cst_8 {dimension_numbers = #tpu.dot_dimension_numbers<[1], [0], [0], [1], [0, 0, 1, 1], [], []>} : vector<2x128xbf16>, vector<128x128xbf16>, vector<2x128xf32> -> vector<2x128xf32>
    %c0_9 = arith.constant 0 : index
    %c0_10 = arith.constant 0 : index
    %12 = vector.load %arg5[%c0_9, %c0_10] : memref<1x128xf32, #tpu.memory_space<vmem>>, vector<1x128xf32>
    %13 = vector.broadcast %12 : vector<1x128xf32> to vector<2x128xf32>
    %14 = arith.addf %11, %13 : vector<2x128xf32>
    %cst_11 = arith.constant 0.000000e+00 : f32
    %15 = vector.broadcast %cst_11 : f32 to vector<2x128xf32>
    %16 = arith.maximumf %14, %15 : vector<2x128xf32>
    %17 = arith.truncf %16 : vector<2x128xf32> to vector<2x128xbf16>
    %c0_12 = arith.constant 0 : index
    %c0_13 = arith.constant 0 : index
    %18 = vector.load %arg6[%c0_12, %c0_13] : memref<128x128xbf16, #tpu.memory_space<vmem>>, vector<128x128xbf16>
    %cst_14 = arith.constant dense<0.000000e+00> : vector<2x128xf32>
    %19 = tpu.matmul %17, %18, %cst_14 {dimension_numbers = #tpu.dot_dimension_numbers<[1], [0], [0], [1], [0, 0, 1, 1], [], []>} : vector<2x128xbf16>, vector<128x128xbf16>, vector<2x128xf32> -> vector<2x128xf32>
    %c0_15 = arith.constant 0 : index
    %c0_16 = arith.constant 0 : index
    %20 = vector.load %arg7[%c0_15, %c0_16] : memref<1x128xf32, #tpu.memory_space<vmem>>, vector<1x128xf32>
    %21 = vector.broadcast %20 : vector<1x128xf32> to vector<2x128xf32>
    %22 = arith.addf %19, %21 : vector<2x128xf32>
    %cst_17 = arith.constant 0.000000e+00 : f32
    %23 = vector.broadcast %cst_17 : f32 to vector<2x128xf32>
    %24 = arith.maximumf %22, %23 : vector<2x128xf32>
    %25 = arith.truncf %24 : vector<2x128xf32> to vector<2x128xbf16>
    %c0_18 = arith.constant 0 : index
    %c0_19 = arith.constant 0 : index
    %26 = vector.load %arg8[%c0_18, %c0_19] : memref<128x128xbf16, #tpu.memory_space<vmem>>, vector<128x128xbf16>
    %cst_20 = arith.constant dense<0.000000e+00> : vector<2x128xf32>
    %27 = tpu.matmul %25, %26, %cst_20 {dimension_numbers = #tpu.dot_dimension_numbers<[1], [0], [0], [1], [0, 0, 1, 1], [], []>} : vector<2x128xbf16>, vector<128x128xbf16>, vector<2x128xf32> -> vector<2x128xf32>
    %c0_21 = arith.constant 0 : index
    %c0_22 = arith.constant 0 : index
    %28 = vector.load %arg9[%c0_21, %c0_22] : memref<1x128xf32, #tpu.memory_space<vmem>>, vector<1x128xf32>
    %29 = vector.broadcast %28 : vector<1x128xf32> to vector<2x128xf32>
    %30 = arith.addf %27, %29 : vector<2x128xf32>
    %c0_23 = arith.constant 0 : index
    %c0_24 = arith.constant 0 : index
    %31 = vector.load %arg10[%c0_23, %c0_24] : memref<2x128xf32, #tpu.memory_space<vmem>>, vector<2x128xf32>
    tpu.vector_store %arg10[%c0_23, %c0_24], %24 {strides = array<i32>} : memref<2x128xf32, #tpu.memory_space<vmem>>, vector<2x128xf32>,
    %c0_25 = arith.constant 0 : index
    %c0_26 = arith.constant 0 : index
    %32 = vector.load %arg11[%c0_25, %c0_26] : memref<2x128xf32, #tpu.memory_space<vmem>>, vector<2x128xf32>
    tpu.vector_store %arg11[%c0_25, %c0_26], %30 {strides = array<i32>} : memref<2x128xf32, #tpu.memory_space<vmem>>, vector<2x128xf32>,
    return
  }
  func.func @transform_0(%arg0: i32) -> (i32, i32) {
    %c0_i32 = arith.constant 0 : i32
    %c0_i32_0 = arith.constant 0 : i32
    return %arg0, %c0_i32 : i32, i32
  }
  func.func @transform_1(%arg0: i32) -> (i32, i32) {
    %c0_i32 = arith.constant 0 : i32
    %c0_i32_0 = arith.constant 0 : i32
    %c0_i32_1 = arith.constant 0 : i32
    return %c0_i32, %c0_i32_0 : i32, i32
  }
  func.func @transform_2(%arg0: i32) -> (i32, i32) {
    %c0_i32 = arith.constant 0 : i32
    %c0_i32_0 = arith.constant 0 : i32
    %c0_i32_1 = arith.constant 0 : i32
    return %c0_i32, %c0_i32_0 : i32, i32
  }
  func.func @transform_3(%arg0: i32) -> (i32, i32) {
    %c0_i32 = arith.constant 0 : i32
    %c0_i32_0 = arith.constant 0 : i32
    %c0_i32_1 = arith.constant 0 : i32
    return %c0_i32, %c0_i32_0 : i32, i32
  }
  func.func @transform_4(%arg0: i32) -> (i32, i32) {
    %c0_i32 = arith.constant 0 : i32
    %c0_i32_0 = arith.constant 0 : i32
    %c0_i32_1 = arith.constant 0 : i32
    return %c0_i32, %c0_i32_0 : i32, i32
  }
  func.func @transform_5(%arg0: i32) -> (i32, i32) {
    %c0_i32 = arith.constant 0 : i32
    %c0_i32_0 = arith.constant 0 : i32
    %c0_i32_1 = arith.constant 0 : i32
    return %c0_i32, %c0_i32_0 : i32, i32
  }
  func.func @transform_6(%arg0: i32) -> (i32, i32) {
    %c0_i32 = arith.constant 0 : i32
    %c0_i32_0 = arith.constant 0 : i32
    %c0_i32_1 = arith.constant 0 : i32
    return %c0_i32, %c0_i32_0 : i32, i32
  }
  func.func @transform_7(%arg0: i32) -> (i32, i32) {
    %c0_i32 = arith.constant 0 : i32
    %c0_i32_0 = arith.constant 0 : i32
    %c0_i32_1 = arith.constant 0 : i32
    return %c0_i32, %c0_i32_0 : i32, i32
  }
  func.func @transform_8(%arg0: i32) -> (i32, i32) {
    %c0_i32 = arith.constant 0 : i32
    %c0_i32_0 = arith.constant 0 : i32
    %c0_i32_1 = arith.constant 0 : i32
    return %c0_i32, %c0_i32_0 : i32, i32
  }
  func.func @transform_9(%arg0: i32) -> (i32, i32) {
    %c0_i32 = arith.constant 0 : i32
    %c0_i32_0 = arith.constant 0 : i32
    return %arg0, %c0_i32 : i32, i32
  }
  func.func @transform_10(%arg0: i32) -> (i32, i32) {
    %c0_i32 = arith.constant 0 : i32
    %c0_i32_0 = arith.constant 0 : i32
    return %arg0, %c0_i32 : i32, i32
  }
}

module attributes {stable_mosaic.version = 11 : i64} {
  func.func @_mlp_kernel(%arg0: i32, %arg1: memref<2x256xf32, #tpu.memory_space<vmem>>, %arg2: memref<256x128xbf16, #tpu.memory_space<vmem>>, %arg3: memref<1x128xf32, #tpu.memory_space<vmem>>, %arg4: memref<128x128xbf16, #tpu.memory_space<vmem>>, %arg5: memref<1x128xf32, #tpu.memory_space<vmem>>, %arg6: memref<128x128xbf16, #tpu.memory_space<vmem>>, %arg7: memref<1x128xf32, #tpu.memory_space<vmem>>, %arg8: memref<128x128xbf16, #tpu.memory_space<vmem>>, %arg9: memref<1x128xf32, #tpu.memory_space<vmem>>, %arg10: memref<2x128xf32, #tpu.memory_space<vmem>>, %arg11: memref<2x128xf32, #tpu.memory_space<vmem>>) attributes {dimension_semantics = [#tpu.dimension_semantics<parallel>], iteration_bounds = array<i64: 1>, scalar_prefetch = 0 : i64, scratch_operands = 0 : i64, tpu.core_type = #tpu.core_type<tc>, window_params = [{transform_indices = @transform_0, window_bounds = array<i64: 2, 256>}, {pipeline_mode = #tpu.pipeline_mode<synchronous>, transform_indices = @transform_1, window_bounds = array<i64: 256, 128>}, {pipeline_mode = #tpu.pipeline_mode<synchronous>, transform_indices = @transform_2, window_bounds = array<i64: 1, 128>}, {pipeline_mode = #tpu.pipeline_mode<synchronous>, transform_indices = @transform_3, window_bounds = array<i64: 128, 128>}, {pipeline_mode = #tpu.pipeline_mode<synchronous>, transform_indices = @transform_4, window_bounds = array<i64: 1, 128>}, {pipeline_mode = #tpu.pipeline_mode<synchronous>, transform_indices = @transform_5, window_bounds = array<i64: 128, 128>}, {pipeline_mode = #tpu.pipeline_mode<synchronous>, transform_indices = @transform_6, window_bounds = array<i64: 1, 128>}, {pipeline_mode = #tpu.pipeline_mode<synchronous>, transform_indices = @transform_7, window_bounds = array<i64: 128, 128>}, {pipeline_mode = #tpu.pipeline_mode<synchronous>, transform_indices = @transform_8, window_bounds = array<i64: 1, 128>}, {transform_indices = @transform_9, window_bounds = array<i64: 2, 128>}, {transform_indices = @transform_10, window_bounds = array<i64: 2, 128>}]} {
    %c0 = arith.constant 0 : index
    %c0_0 = arith.constant 0 : index
    %0 = vector.load %arg1[%c0, %c0_0] : memref<2x256xf32, #tpu.memory_space<vmem>>, vector<2x256xf32>
    %1 = arith.truncf %0 : vector<2x256xf32> to vector<2x256xbf16>
    %c0_1 = arith.constant 0 : index
    %c0_2 = arith.constant 0 : index
    %2 = vector.load %arg2[%c0_1, %c0_2] : memref<256x128xbf16, #tpu.memory_space<vmem>>, vector<256x128xbf16>
    %cst = arith.constant dense<0.000000e+00> : vector<2x128xf32>
    %3 = tpu.matmul %1, %2, %cst {dimension_numbers = #tpu.dot_dimension_numbers<[1], [0], [0], [1], [0, 0, 1, 1], [], []>} : vector<2x256xbf16>, vector<256x128xbf16>, vector<2x128xf32> -> vector<2x128xf32>
    %c0_3 = arith.constant 0 : index
    %c0_4 = arith.constant 0 : index
    %4 = vector.load %arg3[%c0_3, %c0_4] : memref<1x128xf32, #tpu.memory_space<vmem>>, vector<1x128xf32>
    %5 = vector.broadcast %4 : vector<1x128xf32> to vector<2x128xf32>
    %6 = arith.addf %3, %5 : vector<2x128xf32>
    %cst_5 = arith.constant 0.000000e+00 : f32
    %7 = vector.broadcast %cst_5 : f32 to vector<2x128xf32>
    %8 = arith.maximumf %6, %7 : vector<2x128xf32>
    %9 = arith.truncf %8 : vector<2x128xf32> to vector<2x128xbf16>
    %c0_6 = arith.constant 0 : index
    %c0_7 = arith.constant 0 : index
    %10 = vector.load %arg4[%c0_6, %c0_7] : memref<128x128xbf16, #tpu.memory_space<vmem>>, vector<128x128xbf16>
    %cst_8 = arith.constant dense<0.000000e+00> : vector<2x128xf32>
    %11 = tpu.matmul %9, %10, %cst_8 {dimension_numbers = #tpu.dot_dimension_numbers<[1], [0], [0], [1], [0, 0, 1, 1], [], []>} : vector<2x128xbf16>, vector<128x128xbf16>, vector<2x128xf32> -> vector<2x128xf32>
    %c0_9 = arith.constant 0 : index
    %c0_10 = arith.constant 0 : index
    %12 = vector.load %arg5[%c0_9, %c0_10] : memref<1x128xf32, #tpu.memory_space<vmem>>, vector<1x128xf32>
    %13 = vector.broadcast %12 : vector<1x128xf32> to vector<2x128xf32>
    %14 = arith.addf %11, %13 : vector<2x128xf32>
    %cst_11 = arith.constant 0.000000e+00 : f32
    %15 = vector.broadcast %cst_11 : f32 to vector<2x128xf32>
    %16 = arith.maximumf %14, %15 : vector<2x128xf32>
    %17 = arith.truncf %16 : vector<2x128xf32> to vector<2x128xbf16>
    %c0_12 = arith.constant 0 : index
    %c0_13 = arith.constant 0 : index
    %18 = vector.load %arg6[%c0_12, %c0_13] : memref<128x128xbf16, #tpu.memory_space<vmem>>, vector<128x128xbf16>
    %cst_14 = arith.constant dense<0.000000e+00> : vector<2x128xf32>
    %19 = tpu.matmul %17, %18, %cst_14 {dimension_numbers = #tpu.dot_dimension_numbers<[1], [0], [0], [1], [0, 0, 1, 1], [], []>} : vector<2x128xbf16>, vector<128x128xbf16>, vector<2x128xf32> -> vector<2x128xf32>
    %c0_15 = arith.constant 0 : index
    %c0_16 = arith.constant 0 : index
    %20 = vector.load %arg7[%c0_15, %c0_16] : memref<1x128xf32, #tpu.memory_space<vmem>>, vector<1x128xf32>
    %21 = vector.broadcast %20 : vector<1x128xf32> to vector<2x128xf32>
    %22 = arith.addf %19, %21 : vector<2x128xf32>
    %cst_17 = arith.constant 0.000000e+00 : f32
    %23 = vector.broadcast %cst_17 : f32 to vector<2x128xf32>
    %24 = arith.maximumf %22, %23 : vector<2x128xf32>
    %25 = arith.truncf %24 : vector<2x128xf32> to vector<2x128xbf16>
    %c0_18 = arith.constant 0 : index
    %c0_19 = arith.constant 0 : index
    %26 = vector.load %arg8[%c0_18, %c0_19] : memref<128x128xbf16, #tpu.memory_space<vmem>>, vector<128x128xbf16>
    %cst_20 = arith.constant dense<0.000000e+00> : vector<2x128xf32>
    %27 = tpu.matmul %25, %26, %cst_20 {dimension_numbers = #tpu.dot_dimension_numbers<[1], [0], [0], [1], [0, 0, 1, 1], [], []>} : vector<2x128xbf16>, vector<128x128xbf16>, vector<2x128xf32> -> vector<2x128xf32>
    %c0_21 = arith.constant 0 : index
    %c0_22 = arith.constant 0 : index
    %28 = vector.load %arg9[%c0_21, %c0_22] : memref<1x128xf32, #tpu.memory_space<vmem>>, vector<1x128xf32>
    %29 = vector.broadcast %28 : vector<1x128xf32> to vector<2x128xf32>
    %30 = arith.addf %27, %29 : vector<2x128xf32>
    %c0_23 = arith.constant 0 : index
    %c0_24 = arith.constant 0 : index
    %31 = vector.load %arg10[%c0_23, %c0_24] : memref<2x128xf32, #tpu.memory_space<vmem>>, vector<2x128xf32>
    tpu.vector_store %arg10[%c0_23, %c0_24], %24 {strides = array<i32>} : memref<2x128xf32, #tpu.memory_space<vmem>>, vector<2x128xf32>,
    %c0_25 = arith.constant 0 : index
    %c0_26 = arith.constant 0 : index
    %32 = vector.load %arg11[%c0_25, %c0_26] : memref<2x128xf32, #tpu.memory_space<vmem>>, vector<2x128xf32>
    tpu.vector_store %arg11[%c0_25, %c0_26], %30 {strides = array<i32>} : memref<2x128xf32, #tpu.memory_space<vmem>>, vector<2x128xf32>,
    return
  }
  func.func @transform_0(%arg0: i32) -> (i32, i32) {
    %c0_i32 = arith.constant 0 : i32
    %c0_i32_0 = arith.constant 0 : i32
    return %arg0, %c0_i32 : i32, i32
  }
  func.func @transform_1(%arg0: i32) -> (i32, i32) {
    %c0_i32 = arith.constant 0 : i32
    %c0_i32_0 = arith.constant 0 : i32
    %c0_i32_1 = arith.constant 0 : i32
    return %c0_i32, %c0_i32_0 : i32, i32
  }
  func.func @transform_2(%arg0: i32) -> (i32, i32) {
    %c0_i32 = arith.constant 0 : i32
    %c0_i32_0 = arith.constant 0 : i32
    %c0_i32_1 = arith.constant 0 : i32
    return %c0_i32, %c0_i32_0 : i32, i32
  }
  func.func @transform_3(%arg0: i32) -> (i32, i32) {
    %c0_i32 = arith.constant 0 : i32
    %c0_i32_0 = arith.constant 0 : i32
    %c0_i32_1 = arith.constant 0 : i32
    return %c0_i32, %c0_i32_0 : i32, i32
  }
  func.func @transform_4(%arg0: i32) -> (i32, i32) {
    %c0_i32 = arith.constant 0 : i32
    %c0_i32_0 = arith.constant 0 : i32
    %c0_i32_1 = arith.constant 0 : i32
    return %c0_i32, %c0_i32_0 : i32, i32
  }
  func.func @transform_5(%arg0: i32) -> (i32, i32) {
    %c0_i32 = arith.constant 0 : i32
    %c0_i32_0 = arith.constant 0 : i32
    %c0_i32_1 = arith.constant 0 : i32
    return %c0_i32, %c0_i32_0 : i32, i32
  }
  func.func @transform_6(%arg0: i32) -> (i32, i32) {
    %c0_i32 = arith.constant 0 : i32
    %c0_i32_0 = arith.constant 0 : i32
    %c0_i32_1 = arith.constant 0 : i32
    return %c0_i32, %c0_i32_0 : i32, i32
  }
  func.func @transform_7(%arg0: i32) -> (i32, i32) {
    %c0_i32 = arith.constant 0 : i32
    %c0_i32_0 = arith.constant 0 : i32
    %c0_i32_1 = arith.constant 0 : i32
    return %c0_i32, %c0_i32_0 : i32, i32
  }
  func.func @transform_8(%arg0: i32) -> (i32, i32) {
    %c0_i32 = arith.constant 0 : i32
    %c0_i32_0 = arith.constant 0 : i32
    %c0_i32_1 = arith.constant 0 : i32
    return %c0_i32, %c0_i32_0 : i32, i32
  }
  func.func @transform_9(%arg0: i32) -> (i32, i32) {
    %c0_i32 = arith.constant 0 : i32
    %c0_i32_0 = arith.constant 0 : i32
    return %arg0, %c0_i32 : i32, i32
  }
  func.func @transform_10(%arg0: i32) -> (i32, i32) {
    %c0_i32 = arith.constant 0 : i32
    %c0_i32_0 = arith.constant 0 : i32
    return %arg0, %c0_i32 : i32, i32
  }
}

</mosaic_0001>

<bundles_post_ra>
// kernel: tpu_custom_call.1
= control target key start
LH: loop header
LB: loop body
LE: loop exit
PB: predicated region body
PF: predicated region fallthrough
CT: control target
= control target key end

     0   :  { %16 = vsyncpa [#allocation3], 0  ;;  %s1160_s0 = inlined_call_operand.hbm [shape: f32[2,256], index: 0, kind: input, shape index: {}]   ;;  %s1161_s1 = inlined_call_operand.hbm [shape: bf16[256,128], index: 1, kind: input, shape index: {}]   ;;  %s1162_s2 = inlined_call_operand.vmem [shape: f32[1,128], index: 2, kind: input, shape index: {}]   ;;  %s1163_s3 = inlined_call_operand.hbm [shape: bf16[128,128], index: 3, kind: input, shape index: {}]   ;;  %s1164_s4 = inlined_call_operand.vmem [shape: f32[1,128], index: 4, kind: input, shape index: {}]   ;;  %s1165_s5 = inlined_call_operand.hbm [shape: bf16[128,128], index: 5, kind: input, shape index: {}]   ;;  %s1166_s6 = inlined_call_operand.vmem [shape: f32[1,128], index: 6, kind: input, shape index: {}]   ;;  %s1167_s7 = inlined_call_operand.hbm [shape: bf16[128,128], index: 7, kind: input, shape index: {}]   ;;  %s1168_s8 = inlined_call_operand.vmem [shape: f32[1,128], index: 8, kind: input, shape index: {}]   ;;  %s1169_s9 = inlined_call_operand.hbm [shape: f32[2,128], index: 9, kind: output, shape index: {0}]   ;;  %s1170_s10 = inlined_call_operand.hbm [shape: f32[2,128], index: 10, kind: output, shape index: {1}]  }
   0x1   :  { %17 = vsyncpa [#allocation6], 0 }
   0x2   :  { %18 = vsyncpa [#allocation9], 0 }
   0x3   :  { %19 = vsyncpa [#allocation4], 0 }
   0x4   :  { %20 = vsyncpa [#allocation13], 0  ;;  %s1019_s13 = smov [#allocation5]  }
   0x5   :  { %s36_s14 = sshll.u32 %s1019_s13, 4  ;;  %s37_s14 = int_to_ptr.vmem [resolvable:$true] %s36_s14 }
   0x6   :  { %s877_s15 = scalar_lea.vmem %s37_s14, 2048  ;;  %p882_p1 = scmp.lt.s32.totalorder %s37_s14, %s37_s14 }
   0x7   :  { %p878_p0 = scmp.ne.s32.totalorder %s37_s14, %s877_s15  ;;  %p883_p2 = scmp.lt.s32.totalorder %s877_s15, %s877_s15 }
   0x9   :  { %p884_p3 = por %p883_p2, %p882_p1 }
   0xb   :  { %p885_p4 = pnand %p884_p3, %p878_p0 }
   0xd   :  { %888 = shalt.err (!%p885_p4)
}
   0xe   :  { %s1020_s16 = smov 64   ;;  %s1021_s17 = smov 4  }
   0xf   :  { %42 = dma.hbm_to_vmem [thread:$0]  %s1161_s1, 2048, %s37_s14, [#allocation6], %s1020_s16, %s1020_s16, %s1021_s17  }
  0x10   :  { %s1022_s20 = smov [#allocation8]   ;;  %s1023_s22 = smov [#allocation2]  }
  0x11   :  { %s64_s21 = sshll.u32 %s1022_s20, 4  ;;  %s27_s23 = sshll.u32 %s1023_s22, 4  ;;  %s65_s21 = int_to_ptr.vmem [resolvable:$true] %s64_s21  ;;  %s28_s23 = int_to_ptr.vmem [resolvable:$true] %s27_s23 }
  0x12   :  { %s897_s24 = scalar_lea.vmem %s65_s21, 1024  ;;  %p902_p6 = scmp.lt.s32.totalorder %s65_s21, %s65_s21 }
  0x13   :  { %p898_p5 = scmp.ne.s32.totalorder %s65_s21, %s897_s24  ;;  %p903_p7 = scmp.lt.s32.totalorder %s897_s24, %s897_s24 }
  0x15   :  { %p904_p8 = por %p903_p7, %p902_p6 }
  0x17   :  { %p905_p9 = pnand %p904_p8, %p898_p5 }
  0x19   :  { %908 = shalt.err (!%p905_p9)
}
  0x1a   :  { %70 = dma.hbm_to_vmem [thread:$0]  %s1165_s5, 1024, %s65_s21, [#allocation9], %s1020_s16, %s1020_s16, %s1021_s17  }
  0x1b   :  { %s917_s1 = scalar_lea.vmem %s28_s23, 64  ;;  %p922_p11 = scmp.lt.s32.totalorder %s28_s23, %s28_s23 }
  0x1c   :  { %p918_p10 = scmp.ne.s32.totalorder %s28_s23, %s917_s1  ;;  %p923_p12 = scmp.lt.s32.totalorder %s917_s1, %s917_s1 }
  0x1e   :  { %p924_p13 = por %p923_p12, %p922_p11 }
  0x20   :  { %p925_p0 = pnand %p924_p13, %p918_p10 }
  0x22   :  { %928 = shalt.err (!%p925_p0)
}
  0x23   :  { %30 = dma.hbm_to_vmem [thread:$0]  %s1160_s0, 64, %s28_s23, [#allocation3]  }
  0x24   :  { %s1024_s29 = smov [#allocation7]   ;;  %s1025_s11 = smov [#allocation10]  }
  0x25   :  { %s50_s30 = sshll.u32 %s1024_s29, 4  ;;  %s78_s12 = sshll.u32 %s1025_s11, 4  ;;  %s51_s30 = int_to_ptr.vmem [resolvable:$true] %s50_s30  ;;  %s79_s12 = int_to_ptr.vmem [resolvable:$true] %s78_s12 }
  0x26   :  { %s937_s13 = scalar_lea.vmem %s51_s30, 1024  ;;  %p942_p2 = scmp.lt.s32.totalorder %s51_s30, %s51_s30 }
  0x27   :  { %p938_p1 = scmp.ne.s32.totalorder %s51_s30, %s937_s13  ;;  %p943_p3 = scmp.lt.s32.totalorder %s937_s13, %s937_s13 }
  0x29   :  { %p944_p4 = por %p943_p3, %p942_p2 }
  0x2b   :  { %p945_p5 = pnand %p944_p4, %p938_p1 }
  0x2d   :  { %948 = shalt.err (!%p945_p5)
}
  0x2e   :  { %56 = dma.hbm_to_vmem [thread:$0]  %s1163_s3, 1024, %s51_s30, [#allocation6], %s1020_s16, %s1020_s16, %s1021_s17  }
  0x2f   :  { %s957_s0 = scalar_lea.vmem %s79_s12, 1024  ;;  %p962_p7 = scmp.lt.s32.totalorder %s79_s12, %s79_s12 }
  0x30   :  { %p958_p6 = scmp.ne.s32.totalorder %s79_s12, %s957_s0  ;;  %p963_p8 = scmp.lt.s32.totalorder %s957_s0, %s957_s0 }
  0x32   :  { %p964_p9 = por %p963_p8, %p962_p7 }
  0x34   :  { %p965_p10 = pnand %p964_p9, %p958_p6 }
  0x36   :  { %968 = shalt.err (!%p965_p10)
}
  0x37   :  { %84 = dma.hbm_to_vmem [thread:$0]  %s1167_s7, 1024, %s79_s12, [#allocation9], %s1020_s16, %s1020_s16, %s1021_s17  }
  0x38   :  { %1009 = dma.done.wait [#allocation3], 64  }
  0x39   :  { %1010 = vsyncadd [#allocation3], 4294967232 }
  0x3a   :  { %1011 = dma.done.wait [#allocation6], 3072  }
  0x3b   :  { %1012 = vsyncadd [#allocation6], 4294964224 }
  0x3c   :  { %1013 = dma.done.wait [#allocation9], 2048  }
  0x3d   :  { %1014 = vsyncadd [#allocation9], 4294965248  ;;  %v1026_v0 = vmov 0.0   ;;  %v829_v1 = vld [vmem:[#allocation5 + $0x78] sm:$0xff]   ;;  %v831_v3 = vld [vmem:[#allocation5 + $0x70] sm:$0xff]   ;;  %vm1027_vm0 = vmmov 0  }
  0x3e   :  { %758 = vmatprep.subr.bf16.mxu1 %v1026_v0  ;;  %v830_v2 = vld [vmem:[#allocation5 + $0x38] sm:$0xff]   ;;  %709 = vmatprep.subr.bf16.mxu0 %v829_v1  ;;  %v832_v4 = vld [vmem:[#allocation5 + $0x30] sm:$0xff]   ;;  %v833_v5 = vld [vmem:[#allocation5 + $0x68] sm:$0xff]  }
  0x3f   :  { %710 = vmatpush3.bf16.msra.mxu0 %v830_v2  ;;  %v834_v6 = vld [vmem:[#allocation5 + $0x28] sm:$0xff]   ;;  %v835_v7 = vld [vmem:[#allocation5 + $0x60] sm:$0xff]   ;;  %v837_v9 = vld [vmem:[#allocation5 + $0x58] sm:$0xff]   ;;  %774 = vmatprep.mubr.msk.bf16.mxu1 %vm1027_vm0, %v1026_v0 }
  0x40   :  { %711 = vmatprep.subr.bf16.mxu0 %v831_v3  ;;  %v836_v8 = vld [vmem:[#allocation5 + $0x20] sm:$0xff]   ;;  %v838_v10 = vld [vmem:[#allocation5 + $0x18] sm:$0xff]   ;;  %v839_v11 = vld [vmem:[#allocation5 + $0x50] sm:$0xff]  }
  0x41   :  { %v664_v12 = vld.sshfl [vmem:[#allocation2] sm:$0x33 pattern:$0x76325410]  ;;  %v840_v15 = vld [vmem:[#allocation5 + $0x10] sm:$0xff]   ;;  %v841_v18 = vld [vmem:[#allocation5 + $0x48] sm:$0xff]  }
  0x42   :  { %v112_v13 = vcombine.high %v664_v12, %v664_v12  ;;  %v845_v14 = vld [vmem:[#allocation7 + $0x38] sm:$0xff]   ;;  %v846_v17 = vld [vmem:[#allocation7 + $0x30] sm:$0xff]   ;;  %v842_v19 = vld [vmem:[#allocation5 + $0x8] sm:$0xff]   ;;  %v115_v25 = vpack.c.bf16 %v664_v12, %v664_v12 }
  0x43   :  { %712 = vmatpush3.bf16.msra.mxu0 %v832_v4  ;;  %759 = vmatpush3.bf16.msra.mxu1 %v845_v14  ;;  %v847_v20 = vld [vmem:[#allocation7 + $0x28] sm:$0xff]   ;;  %v843_v21 = vld [vmem:[#allocation5 + $0x40] sm:$0xff]   ;;  %v849_v24 = vld [vmem:[#allocation7 + $0x18] sm:$0xff]  }
  0x44   :  { %713 = vmatprep.subr.bf16.mxu0 %v833_v5  ;;  %v116_v16 = vpack.c.bf16 %v112_v13, %v112_v13  ;;  %760 = vmatprep.subr.bf16.mxu1 %v1026_v0  ;;  %v844_v22 = vld [vmem:[#allocation5] sm:$0xff]   ;;  %v850_v26 = vld [vmem:[#allocation7 + $0x10] sm:$0xff]   ;;  %v851_v27 = vld [vmem:[#allocation7 + $0x8] sm:$0xff]  }
  0x45   :  { %v848_v23 = vld [vmem:[#allocation7 + $0x20] sm:$0xff]   ;;  %v853_v29 = vld [vmem:[#allocation8 + $0x38] sm:$0xff]   ;;  %v854_v30 = vld [vmem:[#allocation8 + $0x30] sm:$0xff]  }
  0x46   :  { %284 = vmatprep.mubr.bf16.mxu0 %v116_v16  ;;  %v852_v28 = vld [vmem:[#allocation7] sm:$0xff]   ;;  %v855_v31 = vld [vmem:[#allocation8 + $0x28] sm:$0xff]   ;;  %v857_v33 = vld [vmem:[#allocation8 + $0x18] sm:$0xff]  }
  0x47   :  { %714 = vmatpush3.bf16.msra.mxu0 %v834_v6  ;;  %761 = vmatpush3.bf16.msra.mxu1 %v846_v17  ;;  %v856_v32 = vld [vmem:[#allocation8 + $0x20] sm:$0xff]   ;;  %v858_v34 = vld [vmem:[#allocation8 + $0x10] sm:$0xff]   ;;  %v665_v36 = vld [vmem:[%s1162_s2] ss:$0 sm:$0xff] }
  0x48   :  { %715 = vmatprep.subr.bf16.mxu0 %v835_v7  ;;  %762 = vmatprep.subr.bf16.mxu1 %v1026_v0  ;;  %v859_v44 = vld [vmem:[#allocation8 + $0x8] sm:$0xff]   ;;  %v860_v45 = vld [vmem:[#allocation8] sm:$0xff]   ;;  %v861_v46 = vld [vmem:[#allocation10 + $0x38] sm:$0xff]  }
  0x49   :  { %v862_v47 = vld [vmem:[#allocation10 + $0x30] sm:$0xff]   ;;  %v863_v48 = vld [vmem:[#allocation10 + $0x28] sm:$0xff]   ;;  %v864_v49 = vld [vmem:[#allocation10 + $0x20] sm:$0xff]  }
  0x4a   :  { %v865_v50 = vld [vmem:[#allocation10 + $0x18] sm:$0xff]   ;;  %v866_v51 = vld [vmem:[#allocation10 + $0x10] sm:$0xff]   ;;  %v867_v60 = vld [vmem:[#allocation10 + $0x8] sm:$0xff]  }
  0x4b   :  { %716 = vmatpush3.bf16.msra.mxu0 %v836_v8  ;;  %763 = vmatpush3.bf16.msra.mxu1 %v847_v20  ;;  %v682_v52 = vld [vmem:[%s1164_s4] ss:$0 sm:$0xff]  ;;  %v868_v61 = vld [vmem:[#allocation10] sm:$0xff]   ;;  %s1028_s4 = smov [#allocation11]  }
  0x4c   :  { %717 = vmatprep.subr.bf16.mxu0 %v837_v9  ;;  %764 = vmatprep.subr.bf16.mxu1 %v1026_v0  ;;  %v691_v62 = vld [vmem:[%s1166_s6] ss:$0 sm:$0xff]  ;;  %s639_s20 = sshll.u32 %s1028_s4, 4  ;;  %s640_s20 = int_to_ptr.vmem [resolvable:$true] %s639_s20 }
  0x4d   :  { %s969_s21 = scalar_lea.vmem %s640_s20, 32  ;;  %p974_p12 = scmp.lt.s32.totalorder %s640_s20, %s640_s20 }
  0x4e   :  { %p970_p11 = scmp.ne.s32.totalorder %s640_s20, %s969_s21  ;;  %p975_p13 = scmp.lt.s32.totalorder %s969_s21, %s969_s21 }
  0x4f   :  { %718 = vmatpush3.bf16.msra.mxu0 %v838_v10  ;;  %765 = vmatpush3.bf16.msra.mxu1 %v848_v23 }
  0x50   :  { %719 = vmatprep.subr.bf16.mxu0 %v839_v11  ;;  %766 = vmatprep.subr.bf16.mxu1 %v1026_v0  ;;  %p976_p0 = por %p975_p13, %p974_p12 }
  0x52   :  { %p977_p1 = pnand %p976_p0, %p970_p11 }
  0x53   :  { %720 = vmatpush3.bf16.msra.mxu0 %v840_v15  ;;  %767 = vmatpush3.bf16.msra.mxu1 %v849_v24 }
  0x54   :  { %721 = vmatprep.subr.bf16.mxu0 %v841_v18  ;;  %768 = vmatprep.subr.bf16.mxu1 %v1026_v0 }
  0x57   :  { %722 = vmatpush3.bf16.msra.mxu0 %v842_v19  ;;  %769 = vmatpush3.bf16.msra.mxu1 %v850_v26 }
  0x58   :  { %723 = vmatprep.subr.bf16.mxu0 %v843_v21  ;;  %770 = vmatprep.subr.bf16.mxu1 %v1026_v0 }
  0x5b   :  { %724 = vmatpush3.bf16.msra.mxu0 %v844_v22  ;;  %771 = vmatpush3.bf16.msra.mxu1 %v851_v27 }
  0x5c   :  { %778 = vmatprep.subr.bf16.mxu0 %v1026_v0  ;;  %772 = vmatprep.subr.bf16.mxu1 %v1026_v0 }
  0x5e   :  { %285 = vmatmul.mubr.bf16.vlgmr.msra.gmra.mxu0 %v115_v25 }
  0x5f   :  { %773 = vmatpush3.bf16.msra.mxu1 %v852_v28  ;;  %794 = vmatprep.mubr.msk.bf16.mxu0 %vm1027_vm0, %v1026_v0 }
  0x60   :  { %798 = vmatprep.subr.bf16.mxu1 %v1026_v0  ;;  %779 = vmatpush3.bf16.msra.mxu0 %v853_v29 }
  0x61   :  { %780 = vmatprep.subr.bf16.mxu0 %v1026_v0 }
  0x64   :  { %781 = vmatpush3.bf16.msra.mxu0 %v854_v30 }
  0x65   :  { %782 = vmatprep.subr.bf16.mxu0 %v1026_v0 }
  0x68   :  { %783 = vmatpush3.bf16.msra.mxu0 %v855_v31 }
  0x69   :  { %784 = vmatprep.subr.bf16.mxu0 %v1026_v0 }
  0x6c   :  { %785 = vmatpush3.bf16.msra.mxu0 %v856_v32 }
  0x6d   :  { %786 = vmatprep.subr.bf16.mxu0 %v1026_v0 }
  0x70   :  { %787 = vmatpush3.bf16.msra.mxu0 %v857_v33 }
  0x71   :  { %788 = vmatprep.subr.bf16.mxu0 %v1026_v0 }
  0x74   :  { %789 = vmatpush3.bf16.msra.mxu0 %v858_v34 }
  0x75   :  { %790 = vmatprep.subr.bf16.mxu0 %v1026_v0 }
  0x78   :  { %791 = vmatpush3.bf16.msra.mxu0 %v859_v44 }
  0x79   :  { %792 = vmatprep.subr.bf16.mxu0 %v1026_v0 }
  0x7c   :  { %793 = vmatpush3.bf16.msra.mxu0 %v860_v45 }
 0x11e   :  { %v725_v35 = vpop.f32.mrf.mxu0 }
 0x120   :  { %v726_v37 = vpop.f32.mrf.mxu0 }
 0x121   :  { %v727_v38 = vadd.f32 %v726_v37, %v725_v35 }
 0x122   :  { %v728_v39 = vpop.f32.mrf.mxu0 }
 0x123   :  { %v287_v40 = vadd.f32 %v727_v38, %v665_v36 }
 0x124   :  { %v729_v41 = vpop.f32.mrf.mxu0 }
 0x125   :  { %v292_v42 = vmax.f32 %v287_v40, 0.0 }
 0x127   :  { %v293_v43 = vpack.c.bf16 %v292_v42, %v292_v42 }
 0x129   :  { %775 = vmatmul.mubr.bf16.vlgmr.msra.gmra.mxu1 %v293_v43 }
 0x12a   :  { %814 = vmatprep.mubr.msk.bf16.mxu1 %vm1027_vm0, %v1026_v0  ;;  %799 = vmatpush3.bf16.msra.mxu1 %v861_v46 }
 0x12b   :  { %800 = vmatprep.subr.bf16.mxu1 %v1026_v0 }
 0x12e   :  { %801 = vmatpush3.bf16.msra.mxu1 %v862_v47 }
 0x12f   :  { %802 = vmatprep.subr.bf16.mxu1 %v1026_v0 }
 0x132   :  { %803 = vmatpush3.bf16.msra.mxu1 %v863_v48 }
 0x133   :  { %804 = vmatprep.subr.bf16.mxu1 %v1026_v0 }
 0x136   :  { %805 = vmatpush3.bf16.msra.mxu1 %v864_v49 }
 0x137   :  { %806 = vmatprep.subr.bf16.mxu1 %v1026_v0 }
 0x13a   :  { %807 = vmatpush3.bf16.msra.mxu1 %v865_v50 }
 0x13b   :  { %808 = vmatprep.subr.bf16.mxu1 %v1026_v0 }
 0x13e   :  { %809 = vmatpush3.bf16.msra.mxu1 %v866_v51 }
 0x13f   :  { %810 = vmatprep.subr.bf16.mxu1 %v1026_v0 }
 0x142   :  { %811 = vmatpush3.bf16.msra.mxu1 %v867_v60 }
 0x143   :  { %812 = vmatprep.subr.bf16.mxu1 %v1026_v0 }
 0x146   :  { %813 = vmatpush3.bf16.msra.mxu1 %v868_v61 }
 0x1e9   :  { %v399_v53 = vpop.f32.mrf.mxu1 }
 0x1ea   :  { %v400_v54 = vadd.f32 %v682_v52, %v399_v53 }
 0x1eb   :  { %v776_v55 = vpop.f32.mrf.mxu1 }
 0x1ec   :  { %v405_v56 = vmax.f32 %v400_v54, 0.0 }
 0x1ed   :  { %v402_v57 = vpop.f32.mrf.mxu1 }
 0x1ee   :  { %v406_v58 = vpack.c.bf16 %v405_v56, %v405_v56 }
 0x1ef   :  { %v777_v59 = vpop.f32.mrf.mxu1 }
 0x1f0   :  { %795 = vmatmul.mubr.bf16.vlgmr.msra.gmra.mxu0 %v406_v58 }
 0x2b0   :  { %v512_v63 = vpop.f32.mrf.mxu0 }
 0x2b1   :  { %v513_v1 = vadd.f32 %v691_v62, %v512_v63 }
 0x2b2   :  { %v796_v2 = vpop.f32.mrf.mxu0 }
 0x2b3   :  { %v518_v3 = vmax.f32 %v513_v1, 0.0 }
 0x2b4   :  { %v515_v4 = vpop.f32.mrf.mxu0 }
 0x2b5   :  { %v519_v5 = vpack.c.bf16 %v518_v3, %v518_v3  ;;  %631 = vst [vmem:[#allocation11] sm:$0x3] %v518_v3 }
 0x2b6   :  { %v797_v6 = vpop.f32.mrf.mxu0 }
 0x2b7   :  { %815 = vmatmul.mubr.bf16.vlgmr.msra.gmra.mxu1 %v519_v5 }
 0x2b8   :  { %980 = shalt.err (!%p977_p1)
}
 0x2b9   :  { %642 = dma.vmem_to_hbm [thread:$0]  %s640_s20, 32, %s1169_s9, [#allocation4]   ;;  %v700_v0 = vld [vmem:[%s1168_s8] ss:$0 sm:$0xff] }
 0x2ba   :  { %s1029_s25 = smov [#allocation12]  }
 0x2bb   :  { %s649_s26 = sshll.u32 %s1029_s25, 4  ;;  %s650_s26 = int_to_ptr.vmem [resolvable:$true] %s649_s26 }
 0x2bc   :  { %s989_s1 = scalar_lea.vmem %s650_s26, 32  ;;  %p994_p3 = scmp.lt.s32.totalorder %s650_s26, %s650_s26 }
 0x2bd   :  { %p990_p2 = scmp.ne.s32.totalorder %s650_s26, %s989_s1  ;;  %p995_p4 = scmp.lt.s32.totalorder %s989_s1, %s989_s1 }
 0x2bf   :  { %p996_p5 = por %p995_p4, %p994_p3 }
 0x2c1   :  { %p997_p6 = pnand %p996_p5, %p990_p2 }
 0x377   :  { %v625_v7 = vpop.f32.mrf.mxu1 }
 0x378   :  { %v626_v8 = vadd.f32 %v700_v0, %v625_v7 }
 0x379   :  { %v816_v9 = vpop.f32.mrf.mxu1 }
 0x37a   :  { %632 = vst [vmem:[#allocation12] sm:$0x3] %v626_v8 }
 0x37b   :  { %v628_v10 = vpop.f32.mrf.mxu1 }
 0x37c   :  { %1000 = shalt.err (!%p997_p6)
}
 0x37d   :  { %652 = dma.vmem_to_hbm [thread:$0]  %s650_s26, 32, %s1170_s10, [#allocation13]   ;;  %v817_v11 = vpop.f32.mrf.mxu1 }
 0x37e   :  { %1015 = dma.done.wait [#allocation4], 32  }
 0x37f   :  { %1016 = vsyncadd [#allocation4], 4294967264 }
 0x380   :  { %1017 = dma.done.wait [#allocation13], 32  }
 0x381   :  { %1018 = vsyncadd [#allocation13], 4294967264 }
 0x382   :  { %659 = vsyncpa [#allocation3], 1 }
 0x383   :  { %660 = vsyncpa [#allocation6], 1 }
 0x384   :  { %661 = vsyncpa [#allocation9], 1 }
 0x385   :  { %662 = vsyncpa [#allocation4], 1 }
 0x386   :  { %663 = vsyncpa [#allocation13], 1 }

// kernel: tpu_custom_call.1
= control target key start
LH: loop header
LB: loop body
LE: loop exit
PB: predicated region body
PF: predicated region fallthrough
CT: control target
= control target key end

     0   :  { %16 = vsyncpa [#allocation3], 0  ;;  %s1160_s0 = inlined_call_operand.hbm [shape: f32[2,256], index: 0, kind: input, shape index: {}]   ;;  %s1161_s1 = inlined_call_operand.hbm [shape: bf16[256,128], index: 1, kind: input, shape index: {}]   ;;  %s1162_s2 = inlined_call_operand.vmem [shape: f32[1,128], index: 2, kind: input, shape index: {}]   ;;  %s1163_s3 = inlined_call_operand.hbm [shape: bf16[128,128], index: 3, kind: input, shape index: {}]   ;;  %s1164_s4 = inlined_call_operand.vmem [shape: f32[1,128], index: 4, kind: input, shape index: {}]   ;;  %s1165_s5 = inlined_call_operand.hbm [shape: bf16[128,128], index: 5, kind: input, shape index: {}]   ;;  %s1166_s6 = inlined_call_operand.vmem [shape: f32[1,128], index: 6, kind: input, shape index: {}]   ;;  %s1167_s7 = inlined_call_operand.hbm [shape: bf16[128,128], index: 7, kind: input, shape index: {}]   ;;  %s1168_s8 = inlined_call_operand.vmem [shape: f32[1,128], index: 8, kind: input, shape index: {}]   ;;  %s1169_s9 = inlined_call_operand.hbm [shape: f32[2,128], index: 9, kind: output, shape index: {0}]   ;;  %s1170_s10 = inlined_call_operand.hbm [shape: f32[2,128], index: 10, kind: output, shape index: {1}]  }
   0x1   :  { %17 = vsyncpa [#allocation6], 0 }
   0x2   :  { %18 = vsyncpa [#allocation9], 0 }
   0x3   :  { %19 = vsyncpa [#allocation4], 0 }
   0x4   :  { %20 = vsyncpa [#allocation13], 0  ;;  %s1019_s13 = smov [#allocation5]  }
   0x5   :  { %s36_s14 = sshll.u32 %s1019_s13, 4  ;;  %s37_s14 = int_to_ptr.vmem [resolvable:$true] %s36_s14 }
   0x6   :  { %s877_s15 = scalar_lea.vmem %s37_s14, 2048  ;;  %p882_p1 = scmp.lt.s32.totalorder %s37_s14, %s37_s14 }
   0x7   :  { %p878_p0 = scmp.ne.s32.totalorder %s37_s14, %s877_s15  ;;  %p883_p2 = scmp.lt.s32.totalorder %s877_s15, %s877_s15 }
   0x9   :  { %p884_p3 = por %p883_p2, %p882_p1 }
   0xb   :  { %p885_p4 = pnand %p884_p3, %p878_p0 }
   0xd   :  { %888 = shalt.err (!%p885_p4)
}
   0xe   :  { %s1020_s16 = smov 64   ;;  %s1021_s17 = smov 4  }
   0xf   :  { %42 = dma.hbm_to_vmem [thread:$0]  %s1161_s1, 2048, %s37_s14, [#allocation6], %s1020_s16, %s1020_s16, %s1021_s17  }
  0x10   :  { %s1022_s20 = smov [#allocation8]   ;;  %s1023_s22 = smov [#allocation2]  }
  0x11   :  { %s64_s21 = sshll.u32 %s1022_s20, 4  ;;  %s27_s23 = sshll.u32 %s1023_s22, 4  ;;  %s65_s21 = int_to_ptr.vmem [resolvable:$true] %s64_s21  ;;  %s28_s23 = int_to_ptr.vmem [resolvable:$true] %s27_s23 }
  0x12   :  { %s897_s24 = scalar_lea.vmem %s65_s21, 1024  ;;  %p902_p6 = scmp.lt.s32.totalorder %s65_s21, %s65_s21 }
  0x13   :  { %p898_p5 = scmp.ne.s32.totalorder %s65_s21, %s897_s24  ;;  %p903_p7 = scmp.lt.s32.totalorder %s897_s24, %s897_s24 }
  0x15   :  { %p904_p8 = por %p903_p7, %p902_p6 }
  0x17   :  { %p905_p9 = pnand %p904_p8, %p898_p5 }
  0x19   :  { %908 = shalt.err (!%p905_p9)
}
  0x1a   :  { %70 = dma.hbm_to_vmem [thread:$0]  %s1165_s5, 1024, %s65_s21, [#allocation9], %s1020_s16, %s1020_s16, %s1021_s17  }
  0x1b   :  { %s917_s1 = scalar_lea.vmem %s28_s23, 64  ;;  %p922_p11 = scmp.lt.s32.totalorder %s28_s23, %s28_s23 }
  0x1c   :  { %p918_p10 = scmp.ne.s32.totalorder %s28_s23, %s917_s1  ;;  %p923_p12 = scmp.lt.s32.totalorder %s917_s1, %s917_s1 }
  0x1e   :  { %p924_p13 = por %p923_p12, %p922_p11 }
  0x20   :  { %p925_p0 = pnand %p924_p13, %p918_p10 }
  0x22   :  { %928 = shalt.err (!%p925_p0)
}
  0x23   :  { %30 = dma.hbm_to_vmem [thread:$0]  %s1160_s0, 64, %s28_s23, [#allocation3]  }
  0x24   :  { %s1024_s29 = smov [#allocation7]   ;;  %s1025_s11 = smov [#allocation10]  }
  0x25   :  { %s50_s30 = sshll.u32 %s1024_s29, 4  ;;  %s78_s12 = sshll.u32 %s1025_s11, 4  ;;  %s51_s30 = int_to_ptr.vmem [resolvable:$true] %s50_s30  ;;  %s79_s12 = int_to_ptr.vmem [resolvable:$true] %s78_s12 }
  0x26   :  { %s937_s13 = scalar_lea.vmem %s51_s30, 1024  ;;  %p942_p2 = scmp.lt.s32.totalorder %s51_s30, %s51_s30 }
  0x27   :  { %p938_p1 = scmp.ne.s32.totalorder %s51_s30, %s937_s13  ;;  %p943_p3 = scmp.lt.s32.totalorder %s937_s13, %s937_s13 }
  0x29   :  { %p944_p4 = por %p943_p3, %p942_p2 }
  0x2b   :  { %p945_p5 = pnand %p944_p4, %p938_p1 }
  0x2d   :  { %948 = shalt.err (!%p945_p5)
}
  0x2e   :  { %56 = dma.hbm_to_vmem [thread:$0]  %s1163_s3, 1024, %s51_s30, [#allocation6], %s1020_s16, %s1020_s16, %s1021_s17  }
  0x2f   :  { %s957_s0 = scalar_lea.vmem %s79_s12, 1024  ;;  %p962_p7 = scmp.lt.s32.totalorder %s79_s12, %s79_s12 }
  0x30   :  { %p958_p6 = scmp.ne.s32.totalorder %s79_s12, %s957_s0  ;;  %p963_p8 = scmp.lt.s32.totalorder %s957_s0, %s957_s0 }
  0x32   :  { %p964_p9 = por %p963_p8, %p962_p7 }
  0x34   :  { %p965_p10 = pnand %p964_p9, %p958_p6 }
  0x36   :  { %968 = shalt.err (!%p965_p10)
}
  0x37   :  { %84 = dma.hbm_to_vmem [thread:$0]  %s1167_s7, 1024, %s79_s12, [#allocation9], %s1020_s16, %s1020_s16, %s1021_s17  }
  0x38   :  { %1009 = dma.done.wait [#allocation3], 64  }
  0x39   :  { %1010 = vsyncadd [#allocation3], 4294967232 }
  0x3a   :  { %1011 = dma.done.wait [#allocation6], 3072  }
  0x3b   :  { %1012 = vsyncadd [#allocation6], 4294964224 }
  0x3c   :  { %1013 = dma.done.wait [#allocation9], 2048  }
  0x3d   :  { %1014 = vsyncadd [#allocation9], 4294965248  ;;  %v1026_v0 = vmov 0.0   ;;  %v829_v1 = vld [vmem:[#allocation5 + $0x78] sm:$0xff]   ;;  %v831_v3 = vld [vmem:[#allocation5 + $0x70] sm:$0xff]   ;;  %vm1027_vm0 = vmmov 0  }
  0x3e   :  { %758 = vmatprep.subr.bf16.mxu1 %v1026_v0  ;;  %v830_v2 = vld [vmem:[#allocation5 + $0x38] sm:$0xff]   ;;  %709 = vmatprep.subr.bf16.mxu0 %v829_v1  ;;  %v832_v4 = vld [vmem:[#allocation5 + $0x30] sm:$0xff]   ;;  %v833_v5 = vld [vmem:[#allocation5 + $0x68] sm:$0xff]  }
  0x3f   :  { %710 = vmatpush3.bf16.msra.mxu0 %v830_v2  ;;  %v834_v6 = vld [vmem:[#allocation5 + $0x28] sm:$0xff]   ;;  %v835_v7 = vld [vmem:[#allocation5 + $0x60] sm:$0xff]   ;;  %v837_v9 = vld [vmem:[#allocation5 + $0x58] sm:$0xff]   ;;  %774 = vmatprep.mubr.msk.bf16.mxu1 %vm1027_vm0, %v1026_v0 }
  0x40   :  { %711 = vmatprep.subr.bf16.mxu0 %v831_v3  ;;  %v836_v8 = vld [vmem:[#allocation5 + $0x20] sm:$0xff]   ;;  %v838_v10 = vld [vmem:[#allocation5 + $0x18] sm:$0xff]   ;;  %v839_v11 = vld [vmem:[#allocation5 + $0x50] sm:$0xff]  }
  0x41   :  { %v664_v12 = vld.sshfl [vmem:[#allocation2] sm:$0x33 pattern:$0x76325410]  ;;  %v840_v15 = vld [vmem:[#allocation5 + $0x10] sm:$0xff]   ;;  %v841_v18 = vld [vmem:[#allocation5 + $0x48] sm:$0xff]  }
  0x42   :  { %v112_v13 = vcombine.high %v664_v12, %v664_v12  ;;  %v845_v14 = vld [vmem:[#allocation7 + $0x38] sm:$0xff]   ;;  %v846_v17 = vld [vmem:[#allocation7 + $0x30] sm:$0xff]   ;;  %v842_v19 = vld [vmem:[#allocation5 + $0x8] sm:$0xff]   ;;  %v115_v25 = vpack.c.bf16 %v664_v12, %v664_v12 }
  0x43   :  { %712 = vmatpush3.bf16.msra.mxu0 %v832_v4  ;;  %759 = vmatpush3.bf16.msra.mxu1 %v845_v14  ;;  %v847_v20 = vld [vmem:[#allocation7 + $0x28] sm:$0xff]   ;;  %v843_v21 = vld [vmem:[#allocation5 + $0x40] sm:$0xff]   ;;  %v849_v24 = vld [vmem:[#allocation7 + $0x18] sm:$0xff]  }
  0x44   :  { %713 = vmatprep.subr.bf16.mxu0 %v833_v5  ;;  %v116_v16 = vpack.c.bf16 %v112_v13, %v112_v13  ;;  %760 = vmatprep.subr.bf16.mxu1 %v1026_v0  ;;  %v844_v22 = vld [vmem:[#allocation5] sm:$0xff]   ;;  %v850_v26 = vld [vmem:[#allocation7 + $0x10] sm:$0xff]   ;;  %v851_v27 = vld [vmem:[#allocation7 + $0x8] sm:$0xff]  }
  0x45   :  { %v848_v23 = vld [vmem:[#allocation7 + $0x20] sm:$0xff]   ;;  %v853_v29 = vld [vmem:[#allocation8 + $0x38] sm:$0xff]   ;;  %v854_v30 = vld [vmem:[#allocation8 + $0x30] sm:$0xff]  }
  0x46   :  { %284 = vmatprep.mubr.bf16.mxu0 %v116_v16  ;;  %v852_v28 = vld [vmem:[#allocation7] sm:$0xff]   ;;  %v855_v31 = vld [vmem:[#allocation8 + $0x28] sm:$0xff]   ;;  %v857_v33 = vld [vmem:[#allocation8 + $0x18] sm:$0xff]  }
  0x47   :  { %714 = vmatpush3.bf16.msra.mxu0 %v834_v6  ;;  %761 = vmatpush3.bf16.msra.mxu1 %v846_v17  ;;  %v856_v32 = vld [vmem:[#allocation8 + $0x20] sm:$0xff]   ;;  %v858_v34 = vld [vmem:[#allocation8 + $0x10] sm:$0xff]   ;;  %v665_v36 = vld [vmem:[%s1162_s2] ss:$0 sm:$0xff] }
  0x48   :  { %715 = vmatprep.subr.bf16.mxu0 %v835_v7  ;;  %762 = vmatprep.subr.bf16.mxu1 %v1026_v0  ;;  %v859_v44 = vld [vmem:[#allocation8 + $0x8] sm:$0xff]   ;;  %v860_v45 = vld [vmem:[#allocation8] sm:$0xff]   ;;  %v861_v46 = vld [vmem:[#allocation10 + $0x38] sm:$0xff]  }
  0x49   :  { %v862_v47 = vld [vmem:[#allocation10 + $0x30] sm:$0xff]   ;;  %v863_v48 = vld [vmem:[#allocation10 + $0x28] sm:$0xff]   ;;  %v864_v49 = vld [vmem:[#allocation10 + $0x20] sm:$0xff]  }
  0x4a   :  { %v865_v50 = vld [vmem:[#allocation10 + $0x18] sm:$0xff]   ;;  %v866_v51 = vld [vmem:[#allocation10 + $0x10] sm:$0xff]   ;;  %v867_v60 = vld [vmem:[#allocation10 + $0x8] sm:$0xff]  }
  0x4b   :  { %716 = vmatpush3.bf16.msra.mxu0 %v836_v8  ;;  %763 = vmatpush3.bf16.msra.mxu1 %v847_v20  ;;  %v682_v52 = vld [vmem:[%s1164_s4] ss:$0 sm:$0xff]  ;;  %v868_v61 = vld [vmem:[#allocation10] sm:$0xff]   ;;  %s1028_s4 = smov [#allocation11]  }
  0x4c   :  { %717 = vmatprep.subr.bf16.mxu0 %v837_v9  ;;  %764 = vmatprep.subr.bf16.mxu1 %v1026_v0  ;;  %v691_v62 = vld [vmem:[%s1166_s6] ss:$0 sm:$0xff]  ;;  %s639_s20 = sshll.u32 %s1028_s4, 4  ;;  %s640_s20 = int_to_ptr.vmem [resolvable:$true] %s639_s20 }
  0x4d   :  { %s969_s21 = scalar_lea.vmem %s640_s20, 32  ;;  %p974_p12 = scmp.lt.s32.totalorder %s640_s20, %s640_s20 }
  0x4e   :  { %p970_p11 = scmp.ne.s32.totalorder %s640_s20, %s969_s21  ;;  %p975_p13 = scmp.lt.s32.totalorder %s969_s21, %s969_s21 }
  0x4f   :  { %718 = vmatpush3.bf16.msra.mxu0 %v838_v10  ;;  %765 = vmatpush3.bf16.msra.mxu1 %v848_v23 }
  0x50   :  { %719 = vmatprep.subr.bf16.mxu0 %v839_v11  ;;  %766 = vmatprep.subr.bf16.mxu1 %v1026_v0  ;;  %p976_p0 = por %p975_p13, %p974_p12 }
  0x52   :  { %p977_p1 = pnand %p976_p0, %p970_p11 }
  0x53   :  { %720 = vmatpush3.bf16.msra.mxu0 %v840_v15  ;;  %767 = vmatpush3.bf16.msra.mxu1 %v849_v24 }
  0x54   :  { %721 = vmatprep.subr.bf16.mxu0 %v841_v18  ;;  %768 = vmatprep.subr.bf16.mxu1 %v1026_v0 }
  0x57   :  { %722 = vmatpush3.bf16.msra.mxu0 %v842_v19  ;;  %769 = vmatpush3.bf16.msra.mxu1 %v850_v26 }
  0x58   :  { %723 = vmatprep.subr.bf16.mxu0 %v843_v21  ;;  %770 = vmatprep.subr.bf16.mxu1 %v1026_v0 }
  0x5b   :  { %724 = vmatpush3.bf16.msra.mxu0 %v844_v22  ;;  %771 = vmatpush3.bf16.msra.mxu1 %v851_v27 }
  0x5c   :  { %778 = vmatprep.subr.bf16.mxu0 %v1026_v0  ;;  %772 = vmatprep.subr.bf16.mxu1 %v1026_v0 }
  0x5e   :  { %285 = vmatmul.mubr.bf16.vlgmr.msra.gmra.mxu0 %v115_v25 }
  0x5f   :  { %773 = vmatpush3.bf16.msra.mxu1 %v852_v28  ;;  %794 = vmatprep.mubr.msk.bf16.mxu0 %vm1027_vm0, %v1026_v0 }
  0x60   :  { %798 = vmatprep.subr.bf16.mxu1 %v1026_v0  ;;  %779 = vmatpush3.bf16.msra.mxu0 %v853_v29 }
  0x61   :  { %780 = vmatprep.subr.bf16.mxu0 %v1026_v0 }
  0x64   :  { %781 = vmatpush3.bf16.msra.mxu0 %v854_v30 }
  0x65   :  { %782 = vmatprep.subr.bf16.mxu0 %v1026_v0 }
  0x68   :  { %783 = vmatpush3.bf16.msra.mxu0 %v855_v31 }
  0x69   :  { %784 = vmatprep.subr.bf16.mxu0 %v1026_v0 }
  0x6c   :  { %785 = vmatpush3.bf16.msra.mxu0 %v856_v32 }
  0x6d   :  { %786 = vmatprep.subr.bf16.mxu0 %v1026_v0 }
  0x70   :  { %787 = vmatpush3.bf16.msra.mxu0 %v857_v33 }
  0x71   :  { %788 = vmatprep.subr.bf16.mxu0 %v1026_v0 }
  0x74   :  { %789 = vmatpush3.bf16.msra.mxu0 %v858_v34 }
  0x75   :  { %790 = vmatprep.subr.bf16.mxu0 %v1026_v0 }
  0x78   :  { %791 = vmatpush3.bf16.msra.mxu0 %v859_v44 }
  0x79   :  { %792 = vmatprep.subr.bf16.mxu0 %v1026_v0 }
  0x7c   :  { %793 = vmatpush3.bf16.msra.mxu0 %v860_v45 }
 0x11e   :  { %v725_v35 = vpop.f32.mrf.mxu0 }
 0x120   :  { %v726_v37 = vpop.f32.mrf.mxu0 }
 0x121   :  { %v727_v38 = vadd.f32 %v726_v37, %v725_v35 }
 0x122   :  { %v728_v39 = vpop.f32.mrf.mxu0 }
 0x123   :  { %v287_v40 = vadd.f32 %v727_v38, %v665_v36 }
 0x124   :  { %v729_v41 = vpop.f32.mrf.mxu0 }
 0x125   :  { %v292_v42 = vmax.f32 %v287_v40, 0.0 }
 0x127   :  { %v293_v43 = vpack.c.bf16 %v292_v42, %v292_v42 }
 0x129   :  { %775 = vmatmul.mubr.bf16.vlgmr.msra.gmra.mxu1 %v293_v43 }
 0x12a   :  { %814 = vmatprep.mubr.msk.bf16.mxu1 %vm1027_vm0, %v1026_v0  ;;  %799 = vmatpush3.bf16.msra.mxu1 %v861_v46 }
 0x12b   :  { %800 = vmatprep.subr.bf16.mxu1 %v1026_v0 }
 0x12e   :  { %801 = vmatpush3.bf16.msra.mxu1 %v862_v47 }
 0x12f   :  { %802 = vmatprep.subr.bf16.mxu1 %v1026_v0 }
 0x132   :  { %803 = vmatpush3.bf16.msra.mxu1 %v863_v48 }
 0x133   :  { %804 = vmatprep.subr.bf16.mxu1 %v1026_v0 }
 0x136   :  { %805 = vmatpush3.bf16.msra.mxu1 %v864_v49 }
 0x137   :  { %806 = vmatprep.subr.bf16.mxu1 %v1026_v0 }
 0x13a   :  { %807 = vmatpush3.bf16.msra.mxu1 %v865_v50 }
 0x13b   :  { %808 = vmatprep.subr.bf16.mxu1 %v1026_v0 }
 0x13e   :  { %809 = vmatpush3.bf16.msra.mxu1 %v866_v51 }
 0x13f   :  { %810 = vmatprep.subr.bf16.mxu1 %v1026_v0 }
 0x142   :  { %811 = vmatpush3.bf16.msra.mxu1 %v867_v60 }
 0x143   :  { %812 = vmatprep.subr.bf16.mxu1 %v1026_v0 }
 0x146   :  { %813 = vmatpush3.bf16.msra.mxu1 %v868_v61 }
 0x1e9   :  { %v399_v53 = vpop.f32.mrf.mxu1 }
 0x1ea   :  { %v400_v54 = vadd.f32 %v682_v52, %v399_v53 }
 0x1eb   :  { %v776_v55 = vpop.f32.mrf.mxu1 }
 0x1ec   :  { %v405_v56 = vmax.f32 %v400_v54, 0.0 }
 0x1ed   :  { %v402_v57 = vpop.f32.mrf.mxu1 }
 0x1ee   :  { %v406_v58 = vpack.c.bf16 %v405_v56, %v405_v56 }
 0x1ef   :  { %v777_v59 = vpop.f32.mrf.mxu1 }
 0x1f0   :  { %795 = vmatmul.mubr.bf16.vlgmr.msra.gmra.mxu0 %v406_v58 }
 0x2b0   :  { %v512_v63 = vpop.f32.mrf.mxu0 }
 0x2b1   :  { %v513_v1 = vadd.f32 %v691_v62, %v512_v63 }
 0x2b2   :  { %v796_v2 = vpop.f32.mrf.mxu0 }
 0x2b3   :  { %v518_v3 = vmax.f32 %v513_v1, 0.0 }
 0x2b4   :  { %v515_v4 = vpop.f32.mrf.mxu0 }
 0x2b5   :  { %v519_v5 = vpack.c.bf16 %v518_v3, %v518_v3  ;;  %631 = vst [vmem:[#allocation11] sm:$0x3] %v518_v3 }
 0x2b6   :  { %v797_v6 = vpop.f32.mrf.mxu0 }
 0x2b7   :  { %815 = vmatmul.mubr.bf16.vlgmr.msra.gmra.mxu1 %v519_v5 }
 0x2b8   :  { %980 = shalt.err (!%p977_p1)
}
 0x2b9   :  { %642 = dma.vmem_to_hbm [thread:$0]  %s640_s20, 32, %s1169_s9, [#allocation4]   ;;  %v700_v0 = vld [vmem:[%s1168_s8] ss:$0 sm:$0xff] }
 0x2ba   :  { %s1029_s25 = smov [#allocation12]  }
 0x2bb   :  { %s649_s26 = sshll.u32 %s1029_s25, 4  ;;  %s650_s26 = int_to_ptr.vmem [resolvable:$true] %s649_s26 }
 0x2bc   :  { %s989_s1 = scalar_lea.vmem %s650_s26, 32  ;;  %p994_p3 = scmp.lt.s32.totalorder %s650_s26, %s650_s26 }
 0x2bd   :  { %p990_p2 = scmp.ne.s32.totalorder %s650_s26, %s989_s1  ;;  %p995_p4 = scmp.lt.s32.totalorder %s989_s1, %s989_s1 }
 0x2bf   :  { %p996_p5 = por %p995_p4, %p994_p3 }
 0x2c1   :  { %p997_p6 = pnand %p996_p5, %p990_p2 }
 0x377   :  { %v625_v7 = vpop.f32.mrf.mxu1 }
 0x378   :  { %v626_v8 = vadd.f32 %v700_v0, %v625_v7 }
 0x379   :  { %v816_v9 = vpop.f32.mrf.mxu1 }
 0x37a   :  { %632 = vst [vmem:[#allocation12] sm:$0x3] %v626_v8 }
 0x37b   :  { %v628_v10 = vpop.f32.mrf.mxu1 }
 0x37c   :  { %1000 = shalt.err (!%p997_p6)
}
 0x37d   :  { %652 = dma.vmem_to_hbm [thread:$0]  %s650_s26, 32, %s1170_s10, [#allocation13]   ;;  %v817_v11 = vpop.f32.mrf.mxu1 }
 0x37e   :  { %1015 = dma.done.wait [#allocation4], 32  }
 0x37f   :  { %1016 = vsyncadd [#allocation4], 4294967264 }
 0x380   :  { %1017 = dma.done.wait [#allocation13], 32  }
 0x381   :  { %1018 = vsyncadd [#allocation13], 4294967264 }
 0x382   :  { %659 = vsyncpa [#allocation3], 1 }
 0x383   :  { %660 = vsyncpa [#allocation6], 1 }
 0x384   :  { %661 = vsyncpa [#allocation9], 1 }
 0x385   :  { %662 = vsyncpa [#allocation4], 1 }
 0x386   :  { %663 = vsyncpa [#allocation13], 1 }

</bundles_post_ra>
